<compile_context>
chip_gen: v7x
topology: tpu7x:2x2x1
jax: 0.10.0
libtpu: 0.0.40
codegen_flags: <defaults>
</compile_context>

<pallas_src>
import functools

import jax
import jax.numpy as jnp
from jax.experimental import pallas as pl
from jax.experimental.pallas import tpu as pltpu


# ---------------------------------------------------------------------------
# Small helpers
# ---------------------------------------------------------------------------

def _round_up(x, m):
    return ((x + m - 1) // m) * m


def _round_down(x, m):
    return (x // m) * m


def _tpu_budgets():
    """Generation-aware (target_block_bytes, vmem_limit_bytes)."""
    vmem = None
    try:
        info = pltpu.get_tpu_info()
        vmem = getattr(info, "vmem_capacity_bytes", None)
    except Exception:
        vmem = None
    if vmem is not None and vmem >= 96 * 1024 * 1024:
        # v5e / v6e: 128 MiB physical VMEM -> bigger blocks, 64 MiB scoped.
        return 8 << 20, 64 << 20
    # v7x (64 MiB physical) or unknown generation: stay conservative.
    return 4 << 20, 48 << 20


# ---------------------------------------------------------------------------
# Single-pass (fused) kernels: one grid step sees whole rows (full H*W lanes)
# ---------------------------------------------------------------------------

def _fused_infer_kernel(x_ref, qrange_ref, out_ref, min_ref, max_ref):
    # x_ref:      (rows, HW)  lane-dense channel planes
    # qrange_ref: (rows, 1)   precomputed 2^bits - 1
    x = x_ref[...]
    cmin = jnp.min(x, axis=-1, keepdims=True)
    cmax = jnp.max(x, axis=-1, keepdims=True)
    scale = qrange_ref[...] * (1.0 / (cmax - cmin))   # per-row constant fold
    out_ref[...] = jnp.round((x - cmin) * scale)      # round-half-to-even == torch.round
    min_ref[...] = cmin
    max_ref[...] = cmax


def _fused_train_kernel(x_ref, sel_ref, qrange_ref, out_ref, min_ref, max_ref):
    x = x_ref[...]
    cmin = jnp.min(x, axis=-1, keepdims=True)
    cmax = jnp.max(x, axis=-1, keepdims=True)
    scale = qrange_ref[...] * (1.0 / (cmax - cmin))
    y = (x - cmin) * scale
    q = jnp.round(y)
    # sel is binary {0,1} (int8): select == sel*q + (1-sel)*y, 1 VPU op.
    out_ref[...] = jnp.where(sel_ref[...] != 0, q, y)
    min_ref[...] = cmin
    max_ref[...] = cmax


# ---------------------------------------------------------------------------
# Two-pass (hw-tiled) kernels: used when a full-row block would blow VMEM
# ---------------------------------------------------------------------------

def _stats_kernel(x_ref, min_ref, max_ref, *, hw_total, hw_chunk, mask_last):
    # Grid: (row_blocks, hw_blocks); min/max outputs are resident across the
    # hw ("arbitrary") axis -> standard accumulator pattern.
    j = pl.program_id(1)
    x = x_ref[...]
    if mask_last:
        lane = jax.lax.broadcasted_iota(jnp.int32, x.shape, 1)
        valid = (j * hw_chunk + lane) < hw_total
        x_lo = jnp.where(valid, x, jnp.inf)
        x_hi = jnp.where(valid, x, -jnp.inf)
    else:
        x_lo = x_hi = x
    cmin = jnp.min(x_lo, axis=-1, keepdims=True)
    cmax = jnp.max(x_hi, axis=-1, keepdims=True)

    @pl.when(j == 0)
    def _():
        min_ref[...] = jnp.full(min_ref.shape, jnp.inf, min_ref.dtype)
        max_ref[...] = jnp.full(max_ref.shape, -jnp.inf, max_ref.dtype)

    min_ref[...] = jnp.minimum(min_ref[...], cmin)
    max_ref[...] = jnp.maximum(max_ref[...], cmax)


def _normalize_infer_kernel(x_ref, pmin_ref, pmax_ref, qrange_ref, out_ref):
    x = x_ref[...]
    cmin = pmin_ref[...]
    scale = qrange_ref[...] * (1.0 / (pmax_ref[...] - cmin))
    out_ref[...] = jnp.round((x - cmin) * scale)


def _normalize_train_kernel(x_ref, sel_ref, pmin_ref, pmax_ref, qrange_ref,
                            out_ref):
    x = x_ref[...]
    cmin = pmin_ref[...]
    scale = qrange_ref[...] * (1.0 / (pmax_ref[...] - cmin))
    y = (x - cmin) * scale
    q = jnp.round(y)
    out_ref[...] = jnp.where(sel_ref[...] != 0, q, y)


# ---------------------------------------------------------------------------
# Wrapper
# ---------------------------------------------------------------------------

def quantize_forward(x, quantization_select=None, per_channel_num_bits=None,
                     *, training=False, block_bytes=None):
    """Forward pass of `Quantize`.

    Args:
      x: float array, shape (B, C, H, W) (NCHW, as in PyTorch).
      quantization_select: optional (B, C, H, W) binary tensor (training only).
      per_channel_num_bits: optional (B, C) float tensor (defaults to 8 bits).
      training: static bool selecting the training-mode mixing path.
      block_bytes: optional override of the per-stream block budget (testing).

    Returns:
      (result, per_channel_min, per_channel_max, per_channel_num_bits)
    """
    B, C, H, W = x.shape
    dtype = x.dtype
    bc, hw = B * C, H * W
    itemsize = jnp.dtype(dtype).itemsize

    if per_channel_num_bits is None:
        per_channel_num_bits = 8.0 * jnp.ones((B, C), dtype=dtype)

    # 2^bits - 1, computed once in the wrapper (no per-tile exp2 in-kernel).
    qrange = (jnp.exp2(per_channel_num_bits.astype(dtype)) - 1.0).reshape(bc, 1)

    # Lane-dense slabs: (B, C, H, W) -> (B*C, H*W) is a free contiguous reshape.
    x2d = x.reshape(bc, hw)

    use_select = training and (quantization_select is not None)
    if use_select:
        qs = quantization_select
        if jnp.issubdtype(qs.dtype, jnp.floating):
            sel2d = (qs != 0).astype(jnp.int8).reshape(bc, hw)
        else:
            sel2d = qs.reshape(bc, hw).astype(jnp.int8)
    else:
        sel2d = None

    # Minimum legal sublane tile for the streams in the kernel:
    # f32 -> 8, bf16 -> 16, and 32 when the int8 select stream is present.
    sub_x = max(8, 32 // max(1, itemsize))
    sub = max(sub_x, 32) if use_select else sub_x

    target_block_bytes, vmem_limit = _tpu_budgets()
    if block_bytes is not None:
        target_block_bytes = block_bytes

    out_shapes = (jax.ShapeDtypeStruct((bc, hw), dtype),
                  jax.ShapeDtypeStruct((bc, 1), dtype),
                  jax.ShapeDtypeStruct((bc, 1), dtype))

    rows_min = sub if bc >= sub else bc                 # == bc is always legal
    single_pass = (rows_min * hw * itemsize <= target_block_bytes) or (hw <= 128)

    if single_pass:
        # ----- one pass: each block holds whole rows (full H*W lanes) -----
        rows_budget = max(rows_min,
                          _round_down(target_block_bytes // (hw * itemsize), sub))
        if rows_budget >= bc:
            if bc >= 2 * sub:
                # Whole array fits one block: still split into >=2 grid steps
                # so both v7x TensorCores (and the pipeline) get work.
                rows = _round_up(pl.cdiv(bc, 2), sub)
            else:
                rows = bc
        else:
            rows = rows_budget
        grid = (pl.cdiv(bc, rows),)

        plane_spec = pl.BlockSpec((rows, hw), lambda i: (i, 0))
        stat_spec = pl.BlockSpec((rows, 1), lambda i: (i, 0))
        out_specs = (plane_spec, stat_spec, stat_spec)
        cparams = pltpu.CompilerParams(dimension_semantics=("parallel",),
                                       vmem_limit_bytes=vmem_limit)

        if use_select:
            result2d, pmin, pmax = pl.pallas_call(
                _fused_train_kernel,
                out_shape=out_shapes,
                grid_spec=pltpu.PrefetchScalarGridSpec(
                    num_scalar_prefetch=0, grid=grid,
                    in_specs=[plane_spec, plane_spec, stat_spec],
                    out_specs=out_specs),
                compiler_params=cparams,
            )(x2d, sel2d, qrange)
        else:
            # Inference (or training with default select == ones): never ship
            # the select tensor over HBM.
            result2d, pmin, pmax = pl.pallas_call(
                _fused_infer_kernel,
                out_shape=out_shapes,
                grid_spec=pltpu.PrefetchScalarGridSpec(
                    num_scalar_prefetch=0, grid=grid,
                    in_specs=[plane_spec, stat_spec],
                    out_specs=out_specs),
                compiler_params=cparams,
            )(x2d, qrange)
    else:
        # ----- two passes: tile the hw axis (large feature maps) -----
        rows = rows_min
        hw_chunk = _round_down(target_block_bytes // (rows * itemsize), 128)
        hw_chunk = max(128, min(hw_chunk, _round_down(hw, 128) if hw % 128 == 0
                                else hw_chunk))
        n_rows = pl.cdiv(bc, rows)
        n_hw = pl.cdiv(hw, hw_chunk)
        mask_last = (hw % hw_chunk) != 0

        plane_spec = pl.BlockSpec((rows, hw_chunk), lambda i, j: (i, j))
        stat_spec = pl.BlockSpec((rows, 1), lambda i, j: (i, 0))

        # Pass 1: running per-row min/max (output resident across hw axis).
        pmin, pmax = pl.pallas_call(
            functools.partial(_stats_kernel, hw_total=hw, hw_chunk=hw_chunk,
                              mask_last=mask_last),
            out_shape=(jax.ShapeDtypeStruct((bc, 1), dtype),
                       jax.ShapeDtypeStruct((bc, 1), dtype)),
            grid_spec=pltpu.PrefetchScalarGridSpec(
                num_scalar_prefetch=0, grid=(n_rows, n_hw),
                in_specs=[plane_spec],
                out_specs=(stat_spec, stat_spec)),
            compiler_params=pltpu.CompilerParams(
                dimension_semantics=("parallel", "arbitrary"),
                vmem_limit_bytes=vmem_limit),
        )(x2d)

        # Pass 2: normalize / quantize / (optional) select mix.
        norm_params = pltpu.CompilerParams(
            dimension_semantics=("parallel", "parallel"),
            vmem_limit_bytes=vmem_limit)
        if use_select:
            result2d = pl.pallas_call(
                _normalize_train_kernel,
                out_shape=jax.ShapeDtypeStruct((bc, hw), dtype),
                grid_spec=pltpu.PrefetchScalarGridSpec(
                    num_scalar_prefetch=0, grid=(n_rows, n_hw),
                    in_specs=[plane_spec, plane_spec, stat_spec, stat_spec,
                              stat_spec],
                    out_specs=plane_spec),
                compiler_params=norm_params,
            )(x2d, sel2d, pmin, pmax, qrange)
        else:
            result2d = pl.pallas_call(
                _normalize_infer_kernel,
                out_shape=jax.ShapeDtypeStruct((bc, hw), dtype),
                grid_spec=pltpu.PrefetchScalarGridSpec(
                    num_scalar_prefetch=0, grid=(n_rows, n_hw),
                    in_specs=[plane_spec, stat_spec, stat_spec, stat_spec],
                    out_specs=plane_spec),
                compiler_params=norm_params,
            )(x2d, pmin, pmax, qrange)

    result = result2d.reshape(B, C, H, W)
    return (result, pmin.reshape(B, C), pmax.reshape(B, C),
            per_channel_num_bits)


# ---------------------------------------------------------------------------
# Pure-JAX reference (same math as the PyTorch module; per-row constants are
# folded in the same order as the kernel so the comparison is exact).
# ---------------------------------------------------------------------------

def _reference(x, quantization_select, per_channel_num_bits, training):
    B, C, H, W = x.shape
    pmin = jnp.min(x, axis=(2, 3))
    pmax = jnp.max(x, axis=(2, 3))
    inv = 1.0 / (pmax - pmin)
    qrange = jnp.exp2(per_channel_num_bits) - 1.0
    scale = (qrange * inv).reshape(B, C, 1, 1)
    in_range = (x - pmin.reshape(B, C, 1, 1)) * scale
    q = jnp.round(in_range)
    if training:
        # select is binary {0,1}: identical to sel*q + (1-sel)*in_range
        res = jnp.where(quantization_select != 0, q, in_range)
    else:
        res = q
    return res, pmin, pmax, per_channel_num_bits


if __name__ == "__main__":
    key = jax.random.PRNGKey(0)
    kx, ksel, kbits, kx2, ksel2 = jax.random.split(key, 5)

    # Case 1: training, single-pass fused kernel.
    B, C, H, W = 2, 4, 16, 16
    x = jax.random.normal(kx, (B, C, H, W), dtype=jnp.float32)
    sel = jax.random.bernoulli(ksel, 0.5, (B, C, H, W)).astype(jnp.float32)
    bits = jax.random.randint(kbits, (B, C), 2, 9).astype(jnp.float32)

    out_train = quantize_forward(x, sel, bits, training=True)
    jax.block_until_ready(out_train)
    ref_train = _reference(x, sel, bits, True)
    for got, ref in zip(out_train, ref_train):
        assert jnp.allclose(got, ref, atol=1e-5, rtol=1e-5), "train mismatch"

    # Case 2: inference with defaults (8 bits, select never DMA'd).
    out_infer = quantize_forward(x, training=False)
    jax.block_until_ready(out_infer)
    ref_infer = _reference(x, jnp.ones_like(x),
                           8.0 * jnp.ones((B, C), jnp.float32), False)
    for got, ref in zip(out_infer, ref_infer):
        assert jnp.allclose(got, ref, atol=1e-5, rtol=1e-5), "infer mismatch"

    # Case 3: force the two-pass hw-tiled path (tiny block budget) with a
    # partial (masked) last hw chunk, training mode.
    B2, C2, H2, W2 = 2, 4, 32, 48
    x2 = jax.random.normal(kx2, (B2, C2, H2, W2), dtype=jnp.float32)
    sel2 = jax.random.bernoulli(ksel2, 0.5, (B2, C2, H2, W2)).astype(jnp.float32)
    out_tiled = quantize_forward(x2, sel2, None, training=True,
                                 block_bytes=32 * 1024)
    jax.block_until_ready(out_tiled)
    ref_tiled = _reference(x2, sel2, 8.0 * jnp.ones((B2, C2), jnp.float32), True)
    for got, ref in zip(out_tiled, ref_tiled):
        assert jnp.allclose(got, ref, atol=1e-5, rtol=1e-5), "tiled mismatch"

    print("KERNEL_OK")
</pallas_src>

<mosaic_0001>
module attributes {stable_mosaic.version = 11 : i64} {
  func.func @_fused_train_kernel(%arg0: i32, %arg1: memref<8x256xf32, #tpu.memory_space<vmem>>, %arg2: memref<8x256xi8, #tpu.memory_space<vmem>>, %arg3: memref<8x1xf32, #tpu.memory_space<vmem>>, %arg4: memref<8x256xf32, #tpu.memory_space<vmem>>, %arg5: memref<8x1xf32, #tpu.memory_space<vmem>>, %arg6: memref<8x1xf32, #tpu.memory_space<vmem>>) attributes {dimension_semantics = [#tpu.dimension_semantics<parallel>], iteration_bounds = array<i64: 1>, scalar_prefetch = 0 : i64, scratch_operands = 0 : i64, tpu.core_type = #tpu.core_type<tc>, window_params = [{transform_indices = @transform_0, window_bounds = array<i64: 8, 256>}, {transform_indices = @transform_1, window_bounds = array<i64: 8, 256>}, {transform_indices = @transform_2, window_bounds = array<i64: 8, 1>}, {transform_indices = @transform_3, window_bounds = array<i64: 8, 256>}, {transform_indices = @transform_4, window_bounds = array<i64: 8, 1>}, {transform_indices = @transform_5, window_bounds = array<i64: 8, 1>}]} {
    %c0 = arith.constant 0 : index
    %c0_0 = arith.constant 0 : index
    %0 = vector.load %arg1[%c0, %c0_0] : memref<8x256xf32, #tpu.memory_space<vmem>>, vector<8x256xf32>
    %cst = arith.constant dense<0x7F800000> : vector<8xf32>
    %1 = vector.multi_reduction <minimumf>, %0, %cst [1] : vector<8x256xf32> to vector<8xf32>
    %2 = vector.shape_cast %1 : vector<8xf32> to vector<8x1xf32>
    %cst_1 = arith.constant dense<0xFF800000> : vector<8xf32>
    %3 = vector.multi_reduction <maximumf>, %0, %cst_1 [1] : vector<8x256xf32> to vector<8xf32>
    %4 = vector.shape_cast %3 : vector<8xf32> to vector<8x1xf32>
    %c0_2 = arith.constant 0 : index
    %c0_3 = arith.constant 0 : index
    %5 = vector.load %arg3[%c0_2, %c0_3] : memref<8x1xf32, #tpu.memory_space<vmem>>, vector<8x1xf32>
    %6 = arith.subf %4, %2 : vector<8x1xf32>
    %cst_4 = arith.constant 1.000000e+00 : f32
    %7 = vector.broadcast %cst_4 : f32 to vector<8x1xf32>
    %8 = arith.divf %7, %6 : vector<8x1xf32>
    %9 = arith.mulf %5, %8 : vector<8x1xf32>
    %10 = vector.broadcast %2 : vector<8x1xf32> to vector<8x256xf32>
    %11 = arith.subf %0, %10 : vector<8x256xf32>
    %12 = vector.broadcast %9 : vector<8x1xf32> to vector<8x256xf32>
    %13 = arith.mulf %11, %12 : vector<8x256xf32>
    %14 = math.roundeven %13 : vector<8x256xf32>
    %c0_5 = arith.constant 0 : index
    %c0_6 = arith.constant 0 : index
    %15 = vector.load %arg2[%c0_5, %c0_6] : memref<8x256xi8, #tpu.memory_space<vmem>>, vector<8x256xi8>
    %c0_i8 = arith.constant 0 : i8
    %16 = vector.broadcast %c0_i8 : i8 to vector<8x256xi8>
    %17 = arith.cmpi ne, %15, %16 : vector<8x256xi8>
    %18 = arith.select %17, %14, %13 : vector<8x256xi1>, vector<8x256xf32>
    %c0_7 = arith.constant 0 : index
    %c0_8 = arith.constant 0 : index
    %19 = vector.load %arg4[%c0_7, %c0_8] : memref<8x256xf32, #tpu.memory_space<vmem>>, vector<8x256xf32>
    tpu.vector_store %arg4[%c0_7, %c0_8], %18 {strides = array<i32>} : memref<8x256xf32, #tpu.memory_space<vmem>>, vector<8x256xf32>,
    %c0_9 = arith.constant 0 : index
    %c0_10 = arith.constant 0 : index
    %20 = vector.load %arg5[%c0_9, %c0_10] : memref<8x1xf32, #tpu.memory_space<vmem>>, vector<8x1xf32>
    tpu.vector_store %arg5[%c0_9, %c0_10], %2 {strides = array<i32>} : memref<8x1xf32, #tpu.memory_space<vmem>>, vector<8x1xf32>,
    %c0_11 = arith.constant 0 : index
    %c0_12 = arith.constant 0 : index
    %21 = vector.load %arg6[%c0_11, %c0_12] : memref<8x1xf32, #tpu.memory_space<vmem>>, vector<8x1xf32>
    tpu.vector_store %arg6[%c0_11, %c0_12], %4 {strides = array<i32>} : memref<8x1xf32, #tpu.memory_space<vmem>>, vector<8x1xf32>,
    return
  }
  func.func @transform_0(%arg0: i32) -> (i32, i32) {
    %c0_i32 = arith.constant 0 : i32
    %c0_i32_0 = arith.constant 0 : i32
    return %arg0, %c0_i32 : i32, i32
  }
  func.func @transform_1(%arg0: i32) -> (i32, i32) {
    %c0_i32 = arith.constant 0 : i32
    %c0_i32_0 = arith.constant 0 : i32
    return %arg0, %c0_i32 : i32, i32
  }
  func.func @transform_2(%arg0: i32) -> (i32, i32) {
    %c0_i32 = arith.constant 0 : i32
    %c0_i32_0 = arith.constant 0 : i32
    return %arg0, %c0_i32 : i32, i32
  }
  func.func @transform_3(%arg0: i32) -> (i32, i32) {
    %c0_i32 = arith.constant 0 : i32
    %c0_i32_0 = arith.constant 0 : i32
    return %arg0, %c0_i32 : i32, i32
  }
  func.func @transform_4(%arg0: i32) -> (i32, i32) {
    %c0_i32 = arith.constant 0 : i32
    %c0_i32_0 = arith.constant 0 : i32
    return %arg0, %c0_i32 : i32, i32
  }
  func.func @transform_5(%arg0: i32) -> (i32, i32) {
    %c0_i32 = arith.constant 0 : i32
    %c0_i32_0 = arith.constant 0 : i32
    return %arg0, %c0_i32 : i32, i32
  }
}

</mosaic_0001>

<bundles_post_ra>
// kernel: tpu_custom_call.1
= control target key start
LH: loop header
LB: loop body
LE: loop exit
PB: predicated region body
PF: predicated region fallthrough
CT: control target
= control target key end

     0   :  { %11 = vsyncpa [#allocation3], 0  ;;  %s219_s0 = inlined_call_operand.hbm [shape: f32[8,256], index: 0, kind: input, shape index: {}]   ;;  %s220_s1 = inlined_call_operand.vmem [shape: s8[8,256], index: 1, kind: input, shape index: {}]   ;;  %s221_s2 = inlined_call_operand.vmem [shape: f32[8,1], index: 2, kind: input, shape index: {}]   ;;  %s222_s3 = inlined_call_operand.hbm [shape: f32[8,256], index: 3, kind: output, shape index: {0}]   ;;  %s223_s4 = inlined_call_operand.vmem [shape: f32[8,1], index: 4, kind: output, shape index: {1}]   ;;  %s224_s5 = inlined_call_operand.vmem [shape: f32[8,1], index: 5, kind: output, shape index: {2}]  }
   0x1   :  { %12 = vsyncpa [#allocation4], 0  ;;  %s150_s18 = smov [#allocation2]   ;;  %s102_s22 = scalar_lea.hbm %s219_s0, 256 }
   0x2   :  { %s19_s19 = sshll.u32 %s150_s18, 4  ;;  %p103_p0 = scmp.ne.s32.totalorder %s219_s0, %s102_s22  ;;  %s20_s19 = int_to_ptr.vmem [resolvable:$true] %s19_s19 }
   0x3   :  { %p106_p1 = scmp.lt.u32.totalorder %s102_s22, %s219_s0 }
   0x5   :  { %p108_p2 = pnand %p106_p1, %p103_p0 }
   0x7   :  { %111 = shalt.err (!%p108_p2)
}
   0x8   :  { %s112_s27 = scalar_lea.vmem %s20_s19, 256  ;;  %p117_p4 = scmp.lt.s32.totalorder %s20_s19, %s20_s19 }
   0x9   :  { %p113_p3 = scmp.ne.s32.totalorder %s20_s19, %s112_s27  ;;  %p118_p5 = scmp.lt.s32.totalorder %s112_s27, %s112_s27 }
   0xb   :  { %p119_p6 = por %p118_p5, %p117_p4 }
   0xd   :  { %p120_p7 = pnand %p119_p6, %p113_p3 }
   0xf   :  { %123 = shalt.err (!%p120_p7)
}
  0x10   :  { %22 = dma.hbm_to_vmem [thread:$0]  %s219_s0, 256, %s20_s19, [#allocation3]  }
  0x11   :  { %146 = dma.done.wait [#allocation3], 256  }
  0x12   :  { %147 = vsyncadd [#allocation3], 4294967040  ;;  %v32_v0 = vld [vmem:[#allocation2] sm:$0xff]  ;;  %v33_v1 = vld [vmem:[#allocation2 + $0x8] sm:$0xff]  ;;  %v151_v4 = vmov 0   ;;  %vm67_vm0 = vcmask 7168  }
  0x13   :  { %v34_v2 = vmin.f32 %v32_v0, %v33_v1  ;;  %v37_v3 = vmax.f32 %v32_v0, %v33_v1  ;;  %98 = vset.pattern.permute.xlu1 %v151_v4  ;;  %99 = vset.pattern.permute.xlu0 %v151_v4  ;;  %v40_v8 = vld [vmem:[%s221_s2] sm:$0xff] }
  0x14   :  { %v56_v11 = vld [vmem:[%s220_s1] sm:$0xf] }
  0x15   :  { %35 = vmin.xlane.f32.xlu0 %v34_v2  ;;  %vm57_vm1 = vnez %v56_v11 }
  0x16   :  { %v58_v12 = vsel %vm57_vm1, 16843009, %v151_v4 }
  0x17   :  { %v59_v13 = vunpack.c.0.s8 %v58_v12  ;;  %v60_v14 = vunpack.c.1.s8 %v58_v12 }
  0x19   :  { %38 = vmax.xlane.f32.xlu0 %v37_v3  ;;  %vm61_vm2 = vcmp.ne.s32.totalorder %v59_v13, 0  ;;  %vm62_vm3 = vcmp.ne.s32.totalorder %v60_v14, 0 }
  0xa2   :  { %v36_v5 = vpop.xlane.xlu0 %35 }
  0xa3   :  { %68 = vst.msk [vmem:[%s223_s4] sm:$0xff] %vm67_vm0, %v36_v5  ;;  %v45_v15 = vsub.f32 %v32_v0, %v36_v5  ;;  %v46_v16 = vsub.f32 %v33_v1, %v36_v5  ;;  %s152_s4 = smov [#allocation5]  }
  0xa6   :  { %v39_v6 = vpop.xlane.xlu0 %38 }
  0xa7   :  { %v41_v7 = vsub.f32 %v39_v6, %v36_v5  ;;  %69 = vst.msk [vmem:[%s224_s5] sm:$0xff] %vm67_vm0, %v39_v6  ;;  %s76_s5 = sshll.u32 %s152_s4, 4  ;;  %s77_s5 = int_to_ptr.vmem [resolvable:$true] %s76_s5 }
  0xa8   :  { %s124_s1 = scalar_lea.vmem %s77_s5, 256  ;;  %p129_p9 = scmp.lt.s32.totalorder %s77_s5, %s77_s5 }
  0xa9   :  { %100 = vrcp.f32 %v41_v7  ;;  %p125_p8 = scmp.ne.s32.totalorder %s77_s5, %s124_s1  ;;  %p130_p10 = scmp.lt.s32.totalorder %s124_s1, %s124_s1 }
  0xab   :  { %p131_p11 = por %p130_p10, %p129_p9 }
  0xad   :  { %p132_p12 = pnand %p131_p11, %p125_p8 }
  0xb3   :  { %v101_v9 = vpop.eup %100 }
  0xb4   :  { %v44_v10 = vmul.f32 %v101_v9, %v40_v8 }
  0xb6   :  { %49 = vperm.xlu1 %98, %v44_v10  }
 0x135   :  { %v50_v17 = vpop.permute.xlu1 %49 }
 0x136   :  { %v52_v18 = vmul.f32 %v50_v17, %v45_v15  ;;  %v53_v19 = vmul.f32 %v50_v17, %v46_v16 }
 0x138   :  { %v93_v20 = vround.rtne.f32 %v52_v18  ;;  %v94_v21 = vround.rtne.f32 %v53_v19 }
 0x13a   :  { %v63_v22 = vsel %vm61_vm2, %v93_v20, %v52_v18  ;;  %v64_v23 = vsel %vm62_vm3, %v94_v21, %v53_v19 }
 0x13b   :  { %65 = vst [vmem:[#allocation5] sm:$0xff] %v63_v22  ;;  %66 = vst [vmem:[#allocation5 + $0x8] sm:$0xff] %v64_v23 }
 0x13c   :  { %135 = shalt.err (!%p132_p12)
}
 0x13d   :  { %s136_s13 = scalar_lea.hbm %s222_s3, 256 }
 0x13e   :  { %p137_p13 = scmp.ne.s32.totalorder %s222_s3, %s136_s13  ;;  %p140_p0 = scmp.lt.u32.totalorder %s136_s13, %s222_s3 }
 0x140   :  { %p142_p1 = pnand %p140_p0, %p137_p13 }
 0x142   :  { %145 = shalt.err (!%p142_p1)
}
 0x143   :  { %79 = dma.vmem_to_hbm [thread:$0]  %s77_s5, 256, %s222_s3, [#allocation4]  }
 0x144   :  { %148 = dma.done.wait [#allocation4], 256  }
 0x145   :  { %149 = vsyncadd [#allocation4], 4294967040 }
 0x146   :  { %91 = vsyncpa [#allocation3], 1 }
 0x147   :  { %92 = vsyncpa [#allocation4], 1 }

</bundles_post_ra>
